<compile_context>
chip_gen: v5e
topology: v5e:2x2
jax: 0.10.0
libtpu: 0.0.40
codegen_flags: <defaults>
</compile_context>

<pallas_src>
import functools

import jax
import jax.numpy as jnp
from jax.experimental import pallas as pl
from jax.experimental.pallas import tpu as pltpu

LANES = 128
MAX_TILE_ROWS = 1024   # (1024,128) f32 tile = 512 KiB; 4 inputs x 2 buffers = 4 MiB VMEM


def _make_kernel(*, has_obs, has_data, obs_weight, tile_rows, n_rows,
                 blocks_per_slice, needs_row_mask):
    """Kernel specialized (at trace time) on which masks exist and on tiling."""
    w_minus_1 = float(obs_weight) - 1.0
    groups = tile_rows // 8  # tile_rows is always a multiple of 8

    def kernel(*refs):
        idx = 0
        t_ref = refs[idx]; idx += 1
        p_ref = refs[idx]; idx += 1
        o_ref = d_ref = None
        if has_obs:
            o_ref = refs[idx]; idx += 1
        if has_data:
            d_ref = refs[idx]; idx += 1
        num_ref = refs[idx]; idx += 1
        den_ref = refs[idx] if has_data else None

        i = pl.program_id(1)   # reduction ("arbitrary") axis

        @pl.when(i == 0)
        def _init():
            num_ref[...] = jnp.zeros_like(num_ref)
            if has_data:
                den_ref[...] = jnp.zeros_like(den_ref)

        # Cast BEFORE subtraction so bf16 inputs don't lose precision.
        t = t_ref[...].astype(jnp.float32)
        p = p_ref[...].astype(jnp.float32)
        err = t - p
        err = err * jnp.tanh(err)

        if has_obs:
            m = o_ref[...].astype(jnp.float32)
            # obs_mask * w - (obs_mask - 1)  ==  m * (w - 1) + 1
            err = err * (m * jnp.float32(w_minus_1) + 1.0)

        if needs_row_mask:
            c = pl.program_id(0)   # parallel (megacore) slice axis
            row_ids = jax.lax.broadcasted_iota(jnp.int32, (tile_rows, LANES), 0)
            base = (c * blocks_per_slice + i) * tile_rows
            valid = (base + row_ids) < n_rows
            # Mask BEFORE any accumulation so unspecified data in partial
            # boundary blocks (or the repeated clamped block) never leaks in.
            err = jnp.where(valid, err, 0.0)

        def reduce_to_vreg(term):
            # (tile_rows,128) -> (groups,8,128); VPU adds across groups so the
            # resident output block stays a single (8,128) vector accumulator.
            return term.reshape(groups, 8, LANES).sum(axis=0)[None]

        if has_data:
            d = d_ref[...].astype(jnp.float32)
            if needs_row_mask:
                d = jnp.where(valid, d, 0.0)
            num_ref[...] += reduce_to_vreg(err * d)
            den_ref[...] += reduce_to_vreg(d)
        else:
            num_ref[...] += reduce_to_vreg(err)

    return kernel


def _as_rows(x, n_rows):
    """Row-major flatten to (n_rows, LANES) in the NATIVE dtype.

    Only pads when the element count is not already a multiple of 8*LANES, so
    the common aligned case is a free metadata reshape (no extra HBM pass)."""
    flat = jnp.ravel(x)
    pad = n_rows * LANES - flat.shape[0]
    if pad:
        flat = jnp.pad(flat, (0, pad))
    return flat.reshape(n_rows, LANES)


@functools.partial(jax.jit, static_argnames=("has_obs", "has_data", "obs_weight"))
def _xtanh_loss_impl(target, pred, obs_mask, data_mask, *, has_obs, has_data,
                     obs_weight):
    n_elems = target.size
    n_rows = pl.cdiv(n_elems, LANES * 8) * 8          # rows of 128, multiple of 8
    tile_rows = min(MAX_TILE_ROWS, n_rows)            # still a multiple of 8
    n_row_blocks = pl.cdiv(n_rows, tile_rows)

    # Split rows across two "parallel" slices when there is enough work so a
    # 2-TC chip (v7x) can use both TensorCores; runs sequentially elsewhere.
    num_slices = 2 if n_row_blocks >= 2 else 1
    blocks_per_slice = pl.cdiv(n_row_blocks, num_slices)
    needs_row_mask = (num_slices * blocks_per_slice * tile_rows) != n_rows

    def row_map(c, i):
        # Clamp so the DMA never starts past the array end; logically
        # out-of-range blocks are zeroed by the in-kernel row mask instead.
        return (jnp.minimum(c * blocks_per_slice + i, n_row_blocks - 1), 0)

    tile_spec = pl.BlockSpec((tile_rows, LANES), row_map)

    inputs = [_as_rows(target, n_rows), _as_rows(pred, n_rows)]
    in_specs = [tile_spec, tile_spec]
    if has_obs:
        inputs.append(_as_rows(obs_mask, n_rows))
        in_specs.append(tile_spec)
    if has_data:
        inputs.append(_as_rows(data_mask, n_rows))
        in_specs.append(tile_spec)

    acc_shape = jax.ShapeDtypeStruct((num_slices, 8, LANES), jnp.float32)
    acc_spec = pl.BlockSpec((1, 8, LANES), lambda c, i: (c, 0, 0))
    out_shape = (acc_shape, acc_shape) if has_data else (acc_shape,)
    out_specs = (acc_spec, acc_spec) if has_data else (acc_spec,)

    kernel = _make_kernel(
        has_obs=has_obs, has_data=has_data, obs_weight=float(obs_weight),
        tile_rows=tile_rows, n_rows=n_rows,
        blocks_per_slice=blocks_per_slice, needs_row_mask=needs_row_mask)

    outs = pl.pallas_call(
        kernel,
        out_shape=out_shape,
        grid_spec=pltpu.PrefetchScalarGridSpec(
            num_scalar_prefetch=0,
            grid=(num_slices, blocks_per_slice),
            in_specs=in_specs,
            out_specs=out_specs,
        ),
        compiler_params=pltpu.CompilerParams(
            dimension_semantics=("parallel", "arbitrary")),
    )(*inputs)

    # Single cross-lane/sublane reduction, done once outside the grid loop.
    num = jnp.sum(outs[0])
    if has_data:
        return num / jnp.sum(outs[1])
    return num / jnp.float32(n_elems)


def xtanh_loss(target, pred, obs_mask=None, data_mask=None, obs_weight=1.0):
    """JAX/Pallas equivalent of XTanhLoss(obs_weight)(target, pred, obs_mask, data_mask)."""
    obs_weight = float(obs_weight)
    # obs_weight == 1.0 => weight = m*(1-1)+1 == 1 identically, so the obs_mask
    # stream contributes nothing; drop it to save a full HBM pass.
    has_obs = (obs_mask is not None) and (obs_weight != 1.0)
    has_data = data_mask is not None
    dummy = jnp.zeros((), jnp.float32)
    return _xtanh_loss_impl(
        target, pred,
        obs_mask if has_obs else dummy,
        data_mask if has_data else dummy,
        has_obs=has_obs, has_data=has_data, obs_weight=obs_weight)


def _reference(target, pred, obs_mask=None, data_mask=None, obs_weight=1.0):
    err = target - pred
    err = err * jnp.tanh(err)
    if obs_mask is not None:
        err = err * (obs_mask * obs_weight - (obs_mask - 1.0))
    if data_mask is None:
        return jnp.mean(err)
    return jnp.sum(err * data_mask) / jnp.sum(data_mask)


if __name__ == "__main__":
    key = jax.random.PRNGKey(0)

    def make_inputs(shape, k):
        k1, k2, k3, k4 = jax.random.split(k, 4)
        target = jax.random.normal(k1, shape, dtype=jnp.float32)
        pred = jax.random.normal(k2, shape, dtype=jnp.float32)
        obs_mask = (jax.random.uniform(k3, shape) > 0.5).astype(jnp.float32)
        data_mask = (jax.random.uniform(k4, shape) > 0.3).astype(jnp.float32)
        return target, pred, obs_mask, data_mask

    # (2,4,16,16): small NCHW, single-tile path.
    # (2,3,250,200): exercises multi-tile, 2-slice, ragged tail + row-mask path.
    shape_tols = [((2, 4, 16, 16), 1e-5), ((2, 3, 250, 200), 1e-4)]

    for shape, rtol in shape_tols:
        key, sub = jax.random.split(key)
        target, pred, obs_mask, data_mask = make_inputs(shape, sub)
        cases = [
            dict(obs_mask=None, data_mask=None, obs_weight=2.0),
            dict(obs_mask=obs_mask, data_mask=None, obs_weight=2.0),
            dict(obs_mask=None, data_mask=data_mask, obs_weight=2.0),
            dict(obs_mask=obs_mask, data_mask=data_mask, obs_weight=2.0),
            # obs_weight=1.0 exercises the dropped-obs_mask fast path.
            dict(obs_mask=obs_mask, data_mask=data_mask, obs_weight=1.0),
        ]
        for c in cases:
            out = jax.block_until_ready(xtanh_loss(target, pred, **c))
            ref = _reference(target, pred, **c)
            assert jnp.allclose(out, ref, rtol=rtol, atol=1e-6), (shape, c, out, ref)

    print("KERNEL_OK")
</pallas_src>

<mosaic_0001>
module attributes {stable_mosaic.version = 11 : i64} {
  func.func @kernel(%arg0: i32, %arg1: i32, %arg2: memref<16x128xf32, #tpu.memory_space<vmem>>, %arg3: memref<16x128xf32, #tpu.memory_space<vmem>>, %arg4: memref<1x8x128xf32, #tpu.memory_space<vmem>>) attributes {dimension_semantics = [#tpu.dimension_semantics<parallel>, #tpu.dimension_semantics<arbitrary>], iteration_bounds = array<i64: 1, 1>, scalar_prefetch = 0 : i64, scratch_operands = 0 : i64, tpu.core_type = #tpu.core_type<tc>, window_params = [{transform_indices = @transform_0, window_bounds = array<i64: 16, 128>}, {transform_indices = @transform_1, window_bounds = array<i64: 16, 128>}, {transform_indices = @transform_2, window_bounds = array<i64: 1, 8, 128>}]} {
    %c0_i32 = arith.constant 0 : i32
    %0 = arith.cmpi eq, %arg1, %c0_i32 : i32
    %1 = arith.extui %0 : i1 to i32
    %c0_i32_0 = arith.constant 0 : i32
    %2 = arith.cmpi ne, %1, %c0_i32_0 : i32
    scf.if %2 {
      %cst_10 = arith.constant 0.000000e+00 : f32
      %14 = vector.broadcast %cst_10 : f32 to vector<1x8x128xf32>
      %c0_11 = arith.constant 0 : index
      %c0_12 = arith.constant 0 : index
      %c0_13 = arith.constant 0 : index
      %15 = vector.load %arg4[%c0_11, %c0_12, %c0_13] : memref<1x8x128xf32, #tpu.memory_space<vmem>>, vector<1x8x128xf32>
      tpu.vector_store %arg4[%c0_11, %c0_12, %c0_13], %14 {strides = array<i32>} : memref<1x8x128xf32, #tpu.memory_space<vmem>>, vector<1x8x128xf32>,
    } else {
    }
    %c0 = arith.constant 0 : index
    %c0_1 = arith.constant 0 : index
    %3 = vector.load %arg2[%c0, %c0_1] : memref<16x128xf32, #tpu.memory_space<vmem>>, vector<16x128xf32>
    %c0_2 = arith.constant 0 : index
    %c0_3 = arith.constant 0 : index
    %4 = vector.load %arg3[%c0_2, %c0_3] : memref<16x128xf32, #tpu.memory_space<vmem>>, vector<16x128xf32>
    %5 = arith.subf %3, %4 : vector<16x128xf32>
    %6 = math.tanh %5 : vector<16x128xf32>
    %7 = arith.mulf %5, %6 : vector<16x128xf32>
    %c0_4 = arith.constant 0 : index
    %c0_5 = arith.constant 0 : index
    %c0_6 = arith.constant 0 : index
    %8 = vector.load %arg4[%c0_4, %c0_5, %c0_6] : memref<1x8x128xf32, #tpu.memory_space<vmem>>, vector<1x8x128xf32>
    %9 = vector.shape_cast %7 : vector<16x128xf32> to vector<2x8x128xf32>
    %cst = arith.constant dense<0.000000e+00> : vector<8x128xf32>
    %10 = vector.multi_reduction <add>, %9, %cst [0] : vector<2x8x128xf32> to vector<8x128xf32>
    %11 = vector.shape_cast %10 : vector<8x128xf32> to vector<1x8x128xf32>
    %12 = arith.addf %8, %11 : vector<1x8x128xf32>
    %c0_7 = arith.constant 0 : index
    %c0_8 = arith.constant 0 : index
    %c0_9 = arith.constant 0 : index
    %13 = vector.load %arg4[%c0_7, %c0_8, %c0_9] : memref<1x8x128xf32, #tpu.memory_space<vmem>>, vector<1x8x128xf32>
    tpu.vector_store %arg4[%c0_7, %c0_8, %c0_9], %12 {strides = array<i32>} : memref<1x8x128xf32, #tpu.memory_space<vmem>>, vector<1x8x128xf32>,
    return
  }
  func.func @transform_0(%arg0: i32, %arg1: i32) -> (i32, i32) {
    %c1_i32 = arith.constant 1 : i32
    %0 = arith.muli %arg0, %c1_i32 : i32
    %1 = arith.addi %0, %arg1 : i32
    %c0_i32 = arith.constant 0 : i32
    %2 = arith.minsi %1, %c0_i32 : i32
    %c0_i32_0 = arith.constant 0 : i32
    %c0_i32_1 = arith.constant 0 : i32
    return %2, %c0_i32_0 : i32, i32
  }
  func.func @transform_1(%arg0: i32, %arg1: i32) -> (i32, i32) {
    %c1_i32 = arith.constant 1 : i32
    %0 = arith.muli %arg0, %c1_i32 : i32
    %1 = arith.addi %0, %arg1 : i32
    %c0_i32 = arith.constant 0 : i32
    %2 = arith.minsi %1, %c0_i32 : i32
    %c0_i32_0 = arith.constant 0 : i32
    %c0_i32_1 = arith.constant 0 : i32
    return %2, %c0_i32_0 : i32, i32
  }
  func.func @transform_2(%arg0: i32, %arg1: i32) -> (i32, i32, i32) {
    %c0_i32 = arith.constant 0 : i32
    %c0_i32_0 = arith.constant 0 : i32
    %c0_i32_1 = arith.constant 0 : i32
    return %arg0, %c0_i32, %c0_i32_0 : i32, i32, i32
  }
}

</mosaic_0001>

<bundles_post_ra>
// kernel: _xtanh_loss_impl.1
= control target key start
LH: loop header
LB: loop body
LE: loop exit
PB: predicated region body
PF: predicated region fallthrough
CT: control target
= control target key end

     0   :  { %s145_s0 = inlined_call_operand.vmem [shape: f32[16,128], index: 0, kind: input, shape index: {}]   ;;  %s146_s1 = inlined_call_operand.vmem [shape: f32[16,128], index: 1, kind: input, shape index: {}]   ;;  %s147_s2 = inlined_call_operand.vmem [shape: f32[1,8,128], index: 2, kind: output, shape index: {}]  }
   0x1   :  { %v80_v0 = vld [vmem:[%s145_s0] sm:$0xff]  ;;  %v81_v1 = vld [vmem:[%s145_s0 + $0x8] sm:$0xff] }
   0x2   :  { %v82_v2 = vld [vmem:[%s146_s1] sm:$0xff]  ;;  %v83_v3 = vld [vmem:[%s146_s1 + $0x8] sm:$0xff] }
   0x3   :  { %v84_v4 = vsub.f32 %v80_v0, %v82_v2  ;;  %v85_v5 = vsub.f32 %v81_v1, %v83_v3 }
   0x5   :  { %111 = vtanh.f32 %v84_v4 }
   0x6   :  { %113 = vtanh.f32 %v85_v5 }
   0xb   :  { %v112_v6 = vpop.eup %111 }
   0xc   :  { %v114_v7 = vpop.eup %113  ;;  %v88_v8 = vmul.f32 %v112_v6, %v84_v4 }
   0xd   :  { %v89_v9 = vmul.f32 %v114_v7, %v85_v5 }
   0xf   :  { %v91_v10 = vadd.f32 %v89_v9, %v88_v8 }
  0x11   :  { %93 = vst [vmem:[%s147_s2] sm:$0xff] %v91_v10 }

</bundles_post_ra>
